<compile_context>
chip_gen: v7x
topology: tpu7x:2x2x1
jax: 0.10.0
libtpu: 0.0.40
codegen_flags: <defaults>
</compile_context>

<pallas_src>
import jax
import jax.numpy as jnp
from jax.experimental import pallas as pl
from jax.experimental.pallas import tpu as pltpu

LANE = 128          # TPU lane width
SUBLANE_BF16 = 16   # bf16 packs 16 sublanes per vreg -> batch tile granularity


def _round_up(n, m):
    return ((n + m - 1) // m) * m


def autoencoder_kernel(x_ref,
                       w1_ref, b1_ref,
                       w2_ref, b2_ref,
                       w3_ref, b3_ref,
                       w4_ref, b4_ref,
                       out_ref):
    """One batch tile of the full encoder+decoder forward.

    x arrives as f32 and is cast to bf16 here; weights are pre-cast bf16 with
    128-padded lane dims. Accumulation, bias add and ReLU/Sigmoid stay in f32.
    The two logical outputs are written as one lane-dense slab enc|dec.
    """
    x = x_ref[...].astype(jnp.bfloat16)

    # ---- encoder ----
    h1 = jnp.dot(x, w1_ref[...], preferred_element_type=jnp.float32) + b1_ref[...]
    h1 = jnp.maximum(h1, 0.0)                                   # ReLU

    enc = jnp.dot(h1.astype(jnp.bfloat16), w2_ref[...],
                  preferred_element_type=jnp.float32) + b2_ref[...]
    enc = jnp.maximum(enc, 0.0)                                 # ReLU

    # ---- decoder ----
    h2 = jnp.dot(enc.astype(jnp.bfloat16), w3_ref[...],
                 preferred_element_type=jnp.float32) + b3_ref[...]
    h2 = jnp.maximum(h2, 0.0)                                   # ReLU

    dec = jnp.dot(h2.astype(jnp.bfloat16), w4_ref[...],
                  preferred_element_type=jnp.float32) + b4_ref[...]
    dec = jax.nn.sigmoid(dec)                                   # Sigmoid

    # enc and dec widths are both multiples of 128 -> one clean, unmasked store.
    out_ref[...] = jnp.concatenate([enc, dec], axis=-1)


def init_params(key, input_dim, latent_dim):
    """Deterministic init matching PyTorch Linear shapes.

    PyTorch stores W as [out, in]; we store the transposed [in, out] so the
    kernel can do x @ W directly. Biases are kept as [1, out] rows.
    """
    hidden = input_dim // 2
    dims = [
        (input_dim, hidden),    # encoder linear 1
        (hidden, latent_dim),   # encoder linear 2
        (latent_dim, hidden),   # decoder linear 1
        (hidden, input_dim),    # decoder linear 2
    ]
    params = []
    for (fan_in, fan_out) in dims:
        key, kw, kb = jax.random.split(key, 3)
        bound = 1.0 / (fan_in ** 0.5)   # PyTorch default uniform(-1/sqrt(fan_in), ...)
        w = jax.random.uniform(kw, (fan_in, fan_out), jnp.float32, -bound, bound)
        b = jax.random.uniform(kb, (1, fan_out), jnp.float32, -bound, bound)
        params.append((w, b))
    return params


def prepare_params(params):
    """One-time kernel-side param prep (do this once, not per forward call).

    * Output (lane) dims of every layer are zero-padded to multiples of 128 so
      all intermediate activations, bias loads and the final store are
      lane-dense.
    * Input (K) dims of layers 2-4 are padded to match the padded activation
      widths; padded rows are zero, so they contribute exactly nothing.
    * Weights are cast to bf16 (MXU operands); biases stay f32.
    """
    (w1, b1), (w2, b2), (w3, b3), (w4, b4) = params
    D, H = w1.shape
    L = w2.shape[1]
    Hp, Lp, Dp = _round_up(H, LANE), _round_up(L, LANE), _round_up(D, LANE)

    def pad(a, rows, cols, dtype):
        out = jnp.zeros((rows, cols), dtype)
        return out.at[:a.shape[0], :a.shape[1]].set(a.astype(dtype))

    prepped = (
        pad(w1, D,  Hp, jnp.bfloat16), pad(b1, 1, Hp, jnp.float32),
        pad(w2, Hp, Lp, jnp.bfloat16), pad(b2, 1, Lp, jnp.float32),
        pad(w3, Lp, Hp, jnp.bfloat16), pad(b3, 1, Hp, jnp.float32),
        pad(w4, Hp, Dp, jnp.bfloat16), pad(b4, 1, Dp, jnp.float32),
    )
    dims = dict(D=D, H=H, L=L, Dp=Dp, Hp=Hp, Lp=Lp)
    return prepped, dims


def autoencoder_forward(x, prepped, dims, *, tile_b=None):
    """x: [B, input_dim] float32. Returns (encode [B, latent], decode [B, input_dim])."""
    B, D = x.shape
    assert D == dims["D"]
    L, Lp, Dp = dims["L"], dims["Lp"], dims["Dp"]

    # Batch tile: 16-aligned (bf16 sublane packing); as fat as reasonable so
    # per-grid-step overhead (~0.35 us) is amortized. B=16 -> single grid step.
    if tile_b is None:
        tile_b = min(_round_up(B, SUBLANE_BF16), 512)
    tile_b = _round_up(tile_b, SUBLANE_BF16)

    # Non-divisible batches: pad rows up (row-wise independent), slice back.
    Bp = _round_up(B, tile_b)
    if Bp != B:
        x = jnp.pad(x, ((0, Bp - B), (0, 0)))

    out_w = Lp + Dp                                 # lane-dense output slab width
    (w1, b1, w2, b2, w3, b3, w4, b4) = prepped

    # Weights/biases stay resident across the batch grid (fetched once).
    resident = lambda a: pl.BlockSpec(a.shape, lambda i: (0, 0))

    out = pl.pallas_call(
        autoencoder_kernel,
        out_shape=jax.ShapeDtypeStruct((Bp, out_w), jnp.float32),
        grid_spec=pl.GridSpec(
            grid=(Bp // tile_b,),
            in_specs=[
                pl.BlockSpec((tile_b, D), lambda i: (i, 0)),    # x: streamed per tile
                resident(w1), resident(b1),
                resident(w2), resident(b2),
                resident(w3), resident(b3),
                resident(w4), resident(b4),
            ],
            out_specs=pl.BlockSpec((tile_b, out_w), lambda i: (i, 0)),
        ),
        compiler_params=pltpu.CompilerParams(
            dimension_semantics=("parallel",),
            # NOTE: at realistic widths (e.g. input_dim ~4096 -> ~29 MB bf16
            # weights, double-buffered by the pipeline), raise the scoped VMEM
            # limit here (vmem_limit_bytes=...) and re-derive tile_b for v7x's
            # 64 MiB VMEM. Irrelevant at these toy sizes.
        ),
    )(x, w1, b1, w2, b2, w3, b3, w4, b4)

    return out[:B, :L], out[:B, Lp:Lp + D]


def reference_forward(x, params):
    """Plain-JAX reference with the same bf16-operand / f32-accumulate numerics."""
    q = lambda a: a.astype(jnp.bfloat16).astype(jnp.float32)
    (w1, b1), (w2, b2), (w3, b3), (w4, b4) = params
    h = jnp.maximum(jnp.dot(q(x), q(w1), preferred_element_type=jnp.float32) + b1, 0.0)
    enc = jnp.maximum(jnp.dot(q(h), q(w2), preferred_element_type=jnp.float32) + b2, 0.0)
    h = jnp.maximum(jnp.dot(q(enc), q(w3), preferred_element_type=jnp.float32) + b3, 0.0)
    dec = jax.nn.sigmoid(jnp.dot(q(h), q(w4), preferred_element_type=jnp.float32) + b4)
    return enc, dec


if __name__ == "__main__":
    key = jax.random.PRNGKey(0)

    batch = 16
    input_dim = 32          # -> hidden = 16
    latent_dim = 8

    key, kx = jax.random.split(key)
    x = jax.random.normal(kx, (batch, input_dim), dtype=jnp.float32)

    params = init_params(key, input_dim, latent_dim)
    prepped, dims = prepare_params(params)      # one-time pad + bf16 cast

    enc, dec = autoencoder_forward(x, prepped, dims)
    enc = jax.block_until_ready(enc)
    dec = jax.block_until_ready(dec)

    enc_ref, dec_ref = reference_forward(x, params)
    assert enc.shape == (batch, latent_dim)
    assert dec.shape == (batch, input_dim)
    assert jnp.allclose(enc, enc_ref, atol=1e-4, rtol=1e-4)
    assert jnp.allclose(dec, dec_ref, atol=1e-4, rtol=1e-4)

    print("KERNEL_OK")
</pallas_src>

<mosaic_0001>
module attributes {stable_mosaic.version = 11 : i64} {
  func.func @autoencoder_kernel(%arg0: i32, %arg1: memref<16x32xf32, #tpu.memory_space<vmem>>, %arg2: memref<32x128xbf16, #tpu.memory_space<vmem>>, %arg3: memref<1x128xf32, #tpu.memory_space<vmem>>, %arg4: memref<128x128xbf16, #tpu.memory_space<vmem>>, %arg5: memref<1x128xf32, #tpu.memory_space<vmem>>, %arg6: memref<128x128xbf16, #tpu.memory_space<vmem>>, %arg7: memref<1x128xf32, #tpu.memory_space<vmem>>, %arg8: memref<128x128xbf16, #tpu.memory_space<vmem>>, %arg9: memref<1x128xf32, #tpu.memory_space<vmem>>, %arg10: memref<16x256xf32, #tpu.memory_space<vmem>>) attributes {dimension_semantics = [#tpu.dimension_semantics<parallel>], iteration_bounds = array<i64: 1>, scalar_prefetch = 0 : i64, scratch_operands = 0 : i64, tpu.core_type = #tpu.core_type<tc>, window_params = [{transform_indices = @transform_0, window_bounds = array<i64: 16, 32>}, {pipeline_mode = #tpu.pipeline_mode<synchronous>, transform_indices = @transform_1, window_bounds = array<i64: 32, 128>}, {pipeline_mode = #tpu.pipeline_mode<synchronous>, transform_indices = @transform_2, window_bounds = array<i64: 1, 128>}, {pipeline_mode = #tpu.pipeline_mode<synchronous>, transform_indices = @transform_3, window_bounds = array<i64: 128, 128>}, {pipeline_mode = #tpu.pipeline_mode<synchronous>, transform_indices = @transform_4, window_bounds = array<i64: 1, 128>}, {pipeline_mode = #tpu.pipeline_mode<synchronous>, transform_indices = @transform_5, window_bounds = array<i64: 128, 128>}, {pipeline_mode = #tpu.pipeline_mode<synchronous>, transform_indices = @transform_6, window_bounds = array<i64: 1, 128>}, {pipeline_mode = #tpu.pipeline_mode<synchronous>, transform_indices = @transform_7, window_bounds = array<i64: 128, 128>}, {pipeline_mode = #tpu.pipeline_mode<synchronous>, transform_indices = @transform_8, window_bounds = array<i64: 1, 128>}, {transform_indices = @transform_9, window_bounds = array<i64: 16, 256>}]} {
    %c0 = arith.constant 0 : index
    %c0_0 = arith.constant 0 : index
    %0 = vector.load %arg1[%c0, %c0_0] : memref<16x32xf32, #tpu.memory_space<vmem>>, vector<16x32xf32>
    %1 = arith.truncf %0 : vector<16x32xf32> to vector<16x32xbf16>
    %c0_1 = arith.constant 0 : index
    %c0_2 = arith.constant 0 : index
    %2 = vector.load %arg2[%c0_1, %c0_2] : memref<32x128xbf16, #tpu.memory_space<vmem>>, vector<32x128xbf16>
    %cst = arith.constant dense<0.000000e+00> : vector<16x128xf32>
    %3 = tpu.matmul %1, %2, %cst {dimension_numbers = #tpu.dot_dimension_numbers<[1], [0], [0], [1], [0, 0, 1, 1], [], []>} : vector<16x32xbf16>, vector<32x128xbf16>, vector<16x128xf32> -> vector<16x128xf32>
    %c0_3 = arith.constant 0 : index
    %c0_4 = arith.constant 0 : index
    %4 = vector.load %arg3[%c0_3, %c0_4] : memref<1x128xf32, #tpu.memory_space<vmem>>, vector<1x128xf32>
    %5 = vector.broadcast %4 : vector<1x128xf32> to vector<16x128xf32>
    %6 = arith.addf %3, %5 : vector<16x128xf32>
    %cst_5 = arith.constant 0.000000e+00 : f32
    %7 = vector.broadcast %cst_5 : f32 to vector<16x128xf32>
    %8 = arith.maximumf %6, %7 : vector<16x128xf32>
    %9 = arith.truncf %8 : vector<16x128xf32> to vector<16x128xbf16>
    %c0_6 = arith.constant 0 : index
    %c0_7 = arith.constant 0 : index
    %10 = vector.load %arg4[%c0_6, %c0_7] : memref<128x128xbf16, #tpu.memory_space<vmem>>, vector<128x128xbf16>
    %cst_8 = arith.constant dense<0.000000e+00> : vector<16x128xf32>
    %11 = tpu.matmul %9, %10, %cst_8 {dimension_numbers = #tpu.dot_dimension_numbers<[1], [0], [0], [1], [0, 0, 1, 1], [], []>} : vector<16x128xbf16>, vector<128x128xbf16>, vector<16x128xf32> -> vector<16x128xf32>
    %c0_9 = arith.constant 0 : index
    %c0_10 = arith.constant 0 : index
    %12 = vector.load %arg5[%c0_9, %c0_10] : memref<1x128xf32, #tpu.memory_space<vmem>>, vector<1x128xf32>
    %13 = vector.broadcast %12 : vector<1x128xf32> to vector<16x128xf32>
    %14 = arith.addf %11, %13 : vector<16x128xf32>
    %cst_11 = arith.constant 0.000000e+00 : f32
    %15 = vector.broadcast %cst_11 : f32 to vector<16x128xf32>
    %16 = arith.maximumf %14, %15 : vector<16x128xf32>
    %17 = arith.truncf %16 : vector<16x128xf32> to vector<16x128xbf16>
    %c0_12 = arith.constant 0 : index
    %c0_13 = arith.constant 0 : index
    %18 = vector.load %arg6[%c0_12, %c0_13] : memref<128x128xbf16, #tpu.memory_space<vmem>>, vector<128x128xbf16>
    %cst_14 = arith.constant dense<0.000000e+00> : vector<16x128xf32>
    %19 = tpu.matmul %17, %18, %cst_14 {dimension_numbers = #tpu.dot_dimension_numbers<[1], [0], [0], [1], [0, 0, 1, 1], [], []>} : vector<16x128xbf16>, vector<128x128xbf16>, vector<16x128xf32> -> vector<16x128xf32>
    %c0_15 = arith.constant 0 : index
    %c0_16 = arith.constant 0 : index
    %20 = vector.load %arg7[%c0_15, %c0_16] : memref<1x128xf32, #tpu.memory_space<vmem>>, vector<1x128xf32>
    %21 = vector.broadcast %20 : vector<1x128xf32> to vector<16x128xf32>
    %22 = arith.addf %19, %21 : vector<16x128xf32>
    %cst_17 = arith.constant 0.000000e+00 : f32
    %23 = vector.broadcast %cst_17 : f32 to vector<16x128xf32>
    %24 = arith.maximumf %22, %23 : vector<16x128xf32>
    %25 = arith.truncf %24 : vector<16x128xf32> to vector<16x128xbf16>
    %c0_18 = arith.constant 0 : index
    %c0_19 = arith.constant 0 : index
    %26 = vector.load %arg8[%c0_18, %c0_19] : memref<128x128xbf16, #tpu.memory_space<vmem>>, vector<128x128xbf16>
    %cst_20 = arith.constant dense<0.000000e+00> : vector<16x128xf32>
    %27 = tpu.matmul %25, %26, %cst_20 {dimension_numbers = #tpu.dot_dimension_numbers<[1], [0], [0], [1], [0, 0, 1, 1], [], []>} : vector<16x128xbf16>, vector<128x128xbf16>, vector<16x128xf32> -> vector<16x128xf32>
    %c0_21 = arith.constant 0 : index
    %c0_22 = arith.constant 0 : index
    %28 = vector.load %arg9[%c0_21, %c0_22] : memref<1x128xf32, #tpu.memory_space<vmem>>, vector<1x128xf32>
    %29 = vector.broadcast %28 : vector<1x128xf32> to vector<16x128xf32>
    %30 = arith.addf %27, %29 : vector<16x128xf32>
    %31 = arith.negf %30 : vector<16x128xf32>
    %32 = math.exp %31 : vector<16x128xf32>
    %cst_23 = arith.constant 1.000000e+00 : f32
    %33 = vector.broadcast %cst_23 : f32 to vector<16x128xf32>
    %34 = arith.addf %33, %32 : vector<16x128xf32>
    %35 = arith.divf %33, %34 : vector<16x128xf32>
    %36 = tpu.concatenate %16, %35 in 1 : vector<16x128xf32>, vector<16x128xf32> -> vector<16x256xf32>
    %c0_24 = arith.constant 0 : index
    %c0_25 = arith.constant 0 : index
    %37 = vector.load %arg10[%c0_24, %c0_25] : memref<16x256xf32, #tpu.memory_space<vmem>>, vector<16x256xf32>
    tpu.vector_store %arg10[%c0_24, %c0_25], %36 {strides = array<i32>} : memref<16x256xf32, #tpu.memory_space<vmem>>, vector<16x256xf32>,
    return
  }
  func.func @transform_0(%arg0: i32) -> (i32, i32) {
    %c0_i32 = arith.constant 0 : i32
    %c0_i32_0 = arith.constant 0 : i32
    return %arg0, %c0_i32 : i32, i32
  }
  func.func @transform_1(%arg0: i32) -> (i32, i32) {
    %c0_i32 = arith.constant 0 : i32
    %c0_i32_0 = arith.constant 0 : i32
    %c0_i32_1 = arith.constant 0 : i32
    return %c0_i32, %c0_i32_0 : i32, i32
  }
  func.func @transform_2(%arg0: i32) -> (i32, i32) {
    %c0_i32 = arith.constant 0 : i32
    %c0_i32_0 = arith.constant 0 : i32
    %c0_i32_1 = arith.constant 0 : i32
    return %c0_i32, %c0_i32_0 : i32, i32
  }
  func.func @transform_3(%arg0: i32) -> (i32, i32) {
    %c0_i32 = arith.constant 0 : i32
    %c0_i32_0 = arith.constant 0 : i32
    %c0_i32_1 = arith.constant 0 : i32
    return %c0_i32, %c0_i32_0 : i32, i32
  }
  func.func @transform_4(%arg0: i32) -> (i32, i32) {
    %c0_i32 = arith.constant 0 : i32
    %c0_i32_0 = arith.constant 0 : i32
    %c0_i32_1 = arith.constant 0 : i32
    return %c0_i32, %c0_i32_0 : i32, i32
  }
  func.func @transform_5(%arg0: i32) -> (i32, i32) {
    %c0_i32 = arith.constant 0 : i32
    %c0_i32_0 = arith.constant 0 : i32
    %c0_i32_1 = arith.constant 0 : i32
    return %c0_i32, %c0_i32_0 : i32, i32
  }
  func.func @transform_6(%arg0: i32) -> (i32, i32) {
    %c0_i32 = arith.constant 0 : i32
    %c0_i32_0 = arith.constant 0 : i32
    %c0_i32_1 = arith.constant 0 : i32
    return %c0_i32, %c0_i32_0 : i32, i32
  }
  func.func @transform_7(%arg0: i32) -> (i32, i32) {
    %c0_i32 = arith.constant 0 : i32
    %c0_i32_0 = arith.constant 0 : i32
    %c0_i32_1 = arith.constant 0 : i32
    return %c0_i32, %c0_i32_0 : i32, i32
  }
  func.func @transform_8(%arg0: i32) -> (i32, i32) {
    %c0_i32 = arith.constant 0 : i32
    %c0_i32_0 = arith.constant 0 : i32
    %c0_i32_1 = arith.constant 0 : i32
    return %c0_i32, %c0_i32_0 : i32, i32
  }
  func.func @transform_9(%arg0: i32) -> (i32, i32) {
    %c0_i32 = arith.constant 0 : i32
    %c0_i32_0 = arith.constant 0 : i32
    return %arg0, %c0_i32 : i32, i32
  }
}

</mosaic_0001>

<bundles_post_ra>
// kernel: tpu_custom_call.1
= control target key start
LH: loop header
LB: loop body
LE: loop exit
PB: predicated region body
PF: predicated region fallthrough
CT: control target
= control target key end

     0   :  { %14 = vsyncpa [#allocation3], 0  ;;  %s1066_s0 = inlined_call_operand.hbm [shape: f32[16,32], index: 0, kind: input, shape index: {}]   ;;  %s1067_s1 = inlined_call_operand.hbm [shape: bf16[32,128], index: 1, kind: input, shape index: {}]   ;;  %s1068_s2 = inlined_call_operand.vmem [shape: f32[1,128], index: 2, kind: input, shape index: {}]   ;;  %s1069_s3 = inlined_call_operand.hbm [shape: bf16[128,128], index: 3, kind: input, shape index: {}]   ;;  %s1070_s4 = inlined_call_operand.vmem [shape: f32[1,128], index: 4, kind: input, shape index: {}]   ;;  %s1071_s5 = inlined_call_operand.hbm [shape: bf16[128,128], index: 5, kind: input, shape index: {}]   ;;  %s1072_s6 = inlined_call_operand.vmem [shape: f32[1,128], index: 6, kind: input, shape index: {}]   ;;  %s1073_s7 = inlined_call_operand.hbm [shape: bf16[128,128], index: 7, kind: input, shape index: {}]   ;;  %s1074_s8 = inlined_call_operand.vmem [shape: f32[1,128], index: 8, kind: input, shape index: {}]   ;;  %s1075_s9 = inlined_call_operand.hbm [shape: f32[16,256], index: 9, kind: output, shape index: {}]  }
   0x1   :  { %15 = vsyncpa [#allocation6], 0 }
   0x2   :  { %16 = vsyncpa [#allocation9], 0 }
   0x3   :  { %17 = vsyncpa [#allocation4], 0  ;;  %s872_s30 = smov [#allocation5]   ;;  %s732_s13 = scalar_lea.hbm %s1067_s1, 256 }
   0x4   :  { %s35_s10 = sshll.u32 %s872_s30, 4  ;;  %p733_p0 = scmp.ne.s32.totalorder %s1067_s1, %s732_s13  ;;  %s36_s10 = int_to_ptr.vmem [resolvable:$true] %s35_s10 }
   0x5   :  { %p736_p1 = scmp.lt.u32.totalorder %s732_s13, %s1067_s1 }
   0x7   :  { %p738_p2 = pnand %p736_p1, %p733_p0 }
   0x9   :  { %741 = shalt.err (!%p738_p2)
}
   0xa   :  { %s742_s18 = scalar_lea.vmem %s36_s10, 256  ;;  %p747_p4 = scmp.lt.s32.totalorder %s36_s10, %s36_s10 }
   0xb   :  { %p743_p3 = scmp.ne.s32.totalorder %s36_s10, %s742_s18  ;;  %p748_p5 = scmp.lt.s32.totalorder %s742_s18, %s742_s18 }
   0xd   :  { %p749_p6 = por %p748_p5, %p747_p4 }
   0xf   :  { %p750_p7 = pnand %p749_p6, %p743_p3 }
  0x11   :  { %753 = shalt.err (!%p750_p7)
}
  0x12   :  { %s873_s19 = smov 64   ;;  %s874_s20 = smov 4  }
  0x13   :  { %41 = dma.hbm_to_vmem [thread:$0]  %s1067_s1, 256, %s36_s10, [#allocation6], %s873_s19, %s873_s19, %s874_s20  }
  0x14   :  { %s875_s23 = smov [#allocation8]   ;;  %s876_s25 = smov [#allocation2]  }
  0x15   :  { %s63_s24 = sshll.u32 %s875_s23, 4  ;;  %s23_s26 = sshll.u32 %s876_s25, 4  ;;  %s64_s24 = int_to_ptr.vmem [resolvable:$true] %s63_s24  ;;  %s24_s26 = int_to_ptr.vmem [resolvable:$true] %s23_s26 }
  0x16   :  { %s754_s29 = scalar_lea.hbm %s1071_s5, 1024 }
  0x17   :  { %p755_p8 = scmp.ne.s32.totalorder %s1071_s5, %s754_s29  ;;  %p758_p9 = scmp.lt.u32.totalorder %s754_s29, %s1071_s5 }
  0x19   :  { %p760_p10 = pnand %p758_p9, %p755_p8 }
  0x1b   :  { %763 = shalt.err (!%p760_p10)
}
  0x1c   :  { %s764_s1 = scalar_lea.vmem %s64_s24, 1024  ;;  %p769_p12 = scmp.lt.s32.totalorder %s64_s24, %s64_s24 }
  0x1d   :  { %p765_p11 = scmp.ne.s32.totalorder %s64_s24, %s764_s1  ;;  %p770_p13 = scmp.lt.s32.totalorder %s764_s1, %s764_s1 }
  0x1f   :  { %p771_p0 = por %p770_p13, %p769_p12 }
  0x21   :  { %p772_p1 = pnand %p771_p0, %p765_p11 }
  0x23   :  { %775 = shalt.err (!%p772_p1)
}
  0x24   :  { %69 = dma.hbm_to_vmem [thread:$0]  %s1071_s5, 1024, %s64_s24, [#allocation9], %s873_s19, %s873_s19, %s874_s20  }
  0x25   :  { %s776_s17 = scalar_lea.hbm %s1066_s0, 256 }
  0x26   :  { %p777_p2 = scmp.ne.s32.totalorder %s1066_s0, %s776_s17  ;;  %p780_p3 = scmp.lt.u32.totalorder %s776_s17, %s1066_s0 }
  0x28   :  { %p782_p4 = pnand %p780_p3, %p777_p2 }
  0x2a   :  { %785 = shalt.err (!%p782_p4)
}
  0x2b   :  { %s786_s25 = scalar_lea.vmem %s24_s26, 256  ;;  %p791_p6 = scmp.lt.s32.totalorder %s24_s26, %s24_s26 }
  0x2c   :  { %p787_p5 = scmp.ne.s32.totalorder %s24_s26, %s786_s25  ;;  %p792_p7 = scmp.lt.s32.totalorder %s786_s25, %s786_s25 }
  0x2e   :  { %p793_p8 = por %p792_p7, %p791_p6 }
  0x30   :  { %p794_p9 = pnand %p793_p8, %p787_p5 }
  0x32   :  { %797 = shalt.err (!%p794_p9)
}
  0x33   :  { %s877_s5 = smov 128   ;;  %s878_s24 = smov 8  }
  0x34   :  { %29 = dma.hbm_to_vmem [thread:$0]  %s1066_s0, 256, %s24_s26, [#allocation3], %s877_s5, %s877_s5, %s878_s24  }
  0x35   :  { %s879_s29 = smov [#allocation7]   ;;  %s880_s11 = smov [#allocation10]  }
  0x36   :  { %s49_s30 = sshll.u32 %s879_s29, 4  ;;  %s77_s12 = sshll.u32 %s880_s11, 4  ;;  %s50_s30 = int_to_ptr.vmem [resolvable:$true] %s49_s30  ;;  %s78_s12 = int_to_ptr.vmem [resolvable:$true] %s77_s12 }
  0x37   :  { %s798_s10 = scalar_lea.hbm %s1069_s3, 1024 }
  0x38   :  { %p799_p10 = scmp.ne.s32.totalorder %s1069_s3, %s798_s10  ;;  %p802_p11 = scmp.lt.u32.totalorder %s798_s10, %s1069_s3 }
  0x3a   :  { %p804_p12 = pnand %p802_p11, %p799_p10 }
  0x3c   :  { %807 = shalt.err (!%p804_p12)
}
  0x3d   :  { %s808_s0 = scalar_lea.vmem %s50_s30, 1024  ;;  %p813_p0 = scmp.lt.s32.totalorder %s50_s30, %s50_s30 }
  0x3e   :  { %p809_p13 = scmp.ne.s32.totalorder %s50_s30, %s808_s0  ;;  %p814_p1 = scmp.lt.s32.totalorder %s808_s0, %s808_s0 }
  0x40   :  { %p815_p2 = por %p814_p1, %p813_p0 }
  0x42   :  { %p816_p3 = pnand %p815_p2, %p809_p13 }
  0x44   :  { %819 = shalt.err (!%p816_p3)
}
  0x45   :  { %55 = dma.hbm_to_vmem [thread:$0]  %s1069_s3, 1024, %s50_s30, [#allocation6], %s873_s19, %s873_s19, %s874_s20  }
  0x46   :  { %s820_s23 = scalar_lea.hbm %s1073_s7, 1024 }
  0x47   :  { %p821_p4 = scmp.ne.s32.totalorder %s1073_s7, %s820_s23  ;;  %p824_p5 = scmp.lt.u32.totalorder %s820_s23, %s1073_s7 }
  0x49   :  { %p826_p6 = pnand %p824_p5, %p821_p4 }
  0x4b   :  { %829 = shalt.err (!%p826_p6)
}
  0x4c   :  { %s830_s28 = scalar_lea.vmem %s78_s12, 1024  ;;  %p835_p8 = scmp.lt.s32.totalorder %s78_s12, %s78_s12 }
  0x4d   :  { %p831_p7 = scmp.ne.s32.totalorder %s78_s12, %s830_s28  ;;  %p836_p9 = scmp.lt.s32.totalorder %s830_s28, %s830_s28 }
  0x4f   :  { %p837_p10 = por %p836_p9, %p835_p8 }
  0x51   :  { %p838_p11 = pnand %p837_p10, %p831_p7 }
  0x53   :  { %841 = shalt.err (!%p838_p11)
}
  0x54   :  { %83 = dma.hbm_to_vmem [thread:$0]  %s1073_s7, 1024, %s78_s12, [#allocation9], %s873_s19, %s873_s19, %s874_s20  }
  0x55   :  { %864 = dma.done.wait [#allocation3], 256  }
  0x56   :  { %865 = vsyncadd [#allocation3], 4294967040 }
  0x57   :  { %866 = dma.done.wait [#allocation6], 1280  }
  0x58   :  { %867 = vsyncadd [#allocation6], 4294966016 }
  0x59   :  { %868 = dma.done.wait [#allocation9], 2048  }
  0x5a   :  { %869 = vsyncadd [#allocation9], 4294965248  ;;  %v881_v0 = vmov 0.0   ;;  %vm882_vm0 = vmmov 0   ;;  %v698_v1 = vld [vmem:[#allocation5] sm:$0xff]   ;;  %v699_v2 = vld [vmem:[#allocation5 + $0x8] sm:$0xff]  }
  0x5b   :  { %616 = vmatprep.subr.bf16.mxu0 %v881_v0  ;;  %620 = vmatprep.mubr.msk.bf16.mxu0 %vm882_vm0, %v881_v0  ;;  %v102_v3 = vld [vmem:[#allocation2] sm:$0xff]  ;;  %v103_v4 = vld [vmem:[#allocation2 + $0x8] sm:$0xff]  ;;  %vm128_vm1 = vcmask 261120   ;;  %v702_v8 = vld [vmem:[#allocation7 + $0x10] sm:$0xff]  }
  0x5c   :  { %624 = vmatprep.subr.bf16.mxu1 %v881_v0  ;;  %640 = vmatprep.mubr.msk.bf16.mxu1 %vm882_vm0, %v881_v0  ;;  %v700_v5 = vld [vmem:[#allocation7] sm:$0xff]   ;;  %v104_v6 = vpack.c.bf16 %v103_v4, %v102_v3  ;;  %v701_v7 = vld [vmem:[#allocation7 + $0x8] sm:$0xff]   ;;  %v703_v9 = vld [vmem:[#allocation7 + $0x18] sm:$0xff]  }
  0x5d   :  { %617 = vmatpush3.bf16.msra.mxu0 %v698_v1  ;;  %625 = vmatpush3.bf16.msra.mxu1 %v700_v5  ;;  %v704_v10 = vld [vmem:[#allocation7 + $0x20] sm:$0xff]   ;;  %v705_v11 = vld [vmem:[#allocation7 + $0x28] sm:$0xff]   ;;  %v706_v12 = vld [vmem:[#allocation7 + $0x30] sm:$0xff]  }
  0x5e   :  { %618 = vmatprep.subr.bf16.mxu0 %v881_v0  ;;  %626 = vmatprep.subr.bf16.mxu1 %v881_v0  ;;  %v707_v13 = vld [vmem:[#allocation7 + $0x38] sm:$0xff]   ;;  %v708_v14 = vld [vmem:[#allocation8] sm:$0xff]   ;;  %v709_v15 = vld [vmem:[#allocation8 + $0x8] sm:$0xff]  }
  0x5f   :  { %v710_v16 = vld [vmem:[#allocation8 + $0x10] sm:$0xff]   ;;  %v711_v17 = vld [vmem:[#allocation8 + $0x18] sm:$0xff]   ;;  %v712_v18 = vld [vmem:[#allocation8 + $0x20] sm:$0xff]  }
  0x60   :  { %v713_v19 = vld [vmem:[#allocation8 + $0x28] sm:$0xff]   ;;  %v553_v20 = vld [vmem:[%s1068_s2] ss:$0 sm:$0xff]  ;;  %v714_v30 = vld [vmem:[#allocation8 + $0x30] sm:$0xff]  }
  0x61   :  { %619 = vmatpush3.bf16.msra.mxu0 %v699_v2  ;;  %627 = vmatpush3.bf16.msra.mxu1 %v701_v7  ;;  %v715_v31 = vld [vmem:[#allocation8 + $0x38] sm:$0xff]   ;;  %v716_v32 = vld [vmem:[#allocation10] sm:$0xff]   ;;  %v717_v33 = vld [vmem:[#allocation10 + $0x8] sm:$0xff]  }
  0x62   :  { %644 = vmatprep.subr.bf16.mxu0 %v881_v0  ;;  %628 = vmatprep.subr.bf16.mxu1 %v881_v0  ;;  %v718_v34 = vld [vmem:[#allocation10 + $0x10] sm:$0xff]   ;;  %v719_v35 = vld [vmem:[#allocation10 + $0x18] sm:$0xff]   ;;  %v720_v36 = vld [vmem:[#allocation10 + $0x20] sm:$0xff]  }
  0x63   :  { %v721_v37 = vld [vmem:[#allocation10 + $0x28] sm:$0xff]   ;;  %v557_v38 = vld [vmem:[%s1070_s4] ss:$0 sm:$0xff]  ;;  %v722_v48 = vld [vmem:[#allocation10 + $0x30] sm:$0xff]  }
  0x64   :  { %621 = vmatmul.mubr.msk.bf16.vlgmr.msra.gmra.mrb[0].mxu0 %vm128_vm1, %v104_v6  ;;  %v723_v49 = vld [vmem:[#allocation10 + $0x38] sm:$0xff]   ;;  %v566_v50 = vld [vmem:[%s1072_s6] ss:$0 sm:$0xff]  ;;  %s883_s6 = smov [#allocation11]  }
  0x65   :  { %660 = vmatprep.mubr.msk.bf16.mxu0 %vm882_vm0, %v881_v0  ;;  %629 = vmatpush3.bf16.msra.mxu1 %v702_v8  ;;  %v575_v60 = vld [vmem:[%s1074_s8] ss:$0 sm:$0xff]  ;;  %s539_s13 = sshll.u32 %s883_s6, 4  ;;  %s540_s13 = int_to_ptr.vmem [resolvable:$true] %s539_s13 }
  0x66   :  { %630 = vmatprep.subr.bf16.mxu1 %v881_v0  ;;  %645 = vmatpush3.bf16.msra.mxu0 %v708_v14  ;;  %s842_s8 = scalar_lea.vmem %s540_s13, 512  ;;  %p847_p13 = scmp.lt.s32.totalorder %s540_s13, %s540_s13 }
  0x67   :  { %646 = vmatprep.subr.bf16.mxu0 %v881_v0  ;;  %p843_p12 = scmp.ne.s32.totalorder %s540_s13, %s842_s8  ;;  %p848_p0 = scmp.lt.s32.totalorder %s842_s8, %s842_s8 }
  0x69   :  { %631 = vmatpush3.bf16.msra.mxu1 %v703_v9  ;;  %p849_p1 = por %p848_p0, %p847_p13 }
  0x6a   :  { %632 = vmatprep.subr.bf16.mxu1 %v881_v0  ;;  %647 = vmatpush3.bf16.msra.mxu0 %v709_v15 }
  0x6b   :  { %648 = vmatprep.subr.bf16.mxu0 %v881_v0  ;;  %p850_p2 = pnand %p849_p1, %p843_p12 }
  0x6d   :  { %633 = vmatpush3.bf16.msra.mxu1 %v704_v10 }
  0x6e   :  { %634 = vmatprep.subr.bf16.mxu1 %v881_v0  ;;  %649 = vmatpush3.bf16.msra.mxu0 %v710_v16 }
  0x6f   :  { %650 = vmatprep.subr.bf16.mxu0 %v881_v0 }
  0x71   :  { %635 = vmatpush3.bf16.msra.mxu1 %v705_v11 }
  0x72   :  { %636 = vmatprep.subr.bf16.mxu1 %v881_v0  ;;  %651 = vmatpush3.bf16.msra.mxu0 %v711_v17 }
  0x73   :  { %652 = vmatprep.subr.bf16.mxu0 %v881_v0 }
  0x75   :  { %637 = vmatpush3.bf16.msra.mxu1 %v706_v12 }
  0x76   :  { %638 = vmatprep.subr.bf16.mxu1 %v881_v0  ;;  %653 = vmatpush3.bf16.msra.mxu0 %v712_v18 }
  0x77   :  { %654 = vmatprep.subr.bf16.mxu0 %v881_v0 }
  0x79   :  { %639 = vmatpush3.bf16.msra.mxu1 %v707_v13 }
  0x7a   :  { %664 = vmatprep.subr.bf16.mxu1 %v881_v0  ;;  %655 = vmatpush3.bf16.msra.mxu0 %v713_v19 }
  0x7b   :  { %656 = vmatprep.subr.bf16.mxu0 %v881_v0 }
  0x7e   :  { %657 = vmatpush3.bf16.msra.mxu0 %v714_v30 }
  0x7f   :  { %658 = vmatprep.subr.bf16.mxu0 %v881_v0 }
  0x82   :  { %659 = vmatpush3.bf16.msra.mxu0 %v715_v31 }
 0x137   :  { %v166_v21 = vpop.f32.mrb[0].mxu0 }
 0x138   :  { %v167_v22 = vadd.f32 %v553_v20, %v166_v21  ;;  %v622_v23 = vpop.f32.mrb[1].mxu0 }
 0x139   :  { %v169_v24 = vpop.f32.mrb[2].mxu0 }
 0x13a   :  { %v170_v25 = vadd.f32 %v553_v20, %v169_v24  ;;  %v623_v26 = vpop.f32.mrb[3].mxu0  ;;  %v173_v27 = vmax.f32 %v167_v22, 0.0 }
 0x13c   :  { %v174_v28 = vmax.f32 %v170_v25, 0.0 }
 0x13e   :  { %v175_v29 = vpack.c.bf16 %v174_v28, %v173_v27 }
 0x140   :  { %641 = vmatmul.mubr.bf16.vlgmr.msra.gmra.mrb[0].mxu1 %v175_v29 }
 0x141   :  { %680 = vmatprep.mubr.msk.bf16.mxu1 %vm882_vm0, %v881_v0  ;;  %665 = vmatpush3.bf16.msra.mxu1 %v716_v32 }
 0x142   :  { %666 = vmatprep.subr.bf16.mxu1 %v881_v0 }
 0x145   :  { %667 = vmatpush3.bf16.msra.mxu1 %v717_v33 }
 0x146   :  { %668 = vmatprep.subr.bf16.mxu1 %v881_v0 }
 0x149   :  { %669 = vmatpush3.bf16.msra.mxu1 %v718_v34 }
 0x14a   :  { %670 = vmatprep.subr.bf16.mxu1 %v881_v0 }
 0x14d   :  { %671 = vmatpush3.bf16.msra.mxu1 %v719_v35 }
 0x14e   :  { %672 = vmatprep.subr.bf16.mxu1 %v881_v0 }
 0x151   :  { %673 = vmatpush3.bf16.msra.mxu1 %v720_v36 }
 0x152   :  { %674 = vmatprep.subr.bf16.mxu1 %v881_v0 }
 0x155   :  { %675 = vmatpush3.bf16.msra.mxu1 %v721_v37 }
 0x156   :  { %676 = vmatprep.subr.bf16.mxu1 %v881_v0 }
 0x159   :  { %677 = vmatpush3.bf16.msra.mxu1 %v722_v48 }
 0x15a   :  { %678 = vmatprep.subr.bf16.mxu1 %v881_v0 }
 0x15d   :  { %679 = vmatpush3.bf16.msra.mxu1 %v723_v49 }
 0x213   :  { %v281_v39 = vpop.f32.mrb[0].mxu1 }
 0x214   :  { %v282_v40 = vadd.f32 %v557_v38, %v281_v39  ;;  %v642_v41 = vpop.f32.mrb[1].mxu1 }
 0x215   :  { %v284_v42 = vpop.f32.mrb[2].mxu1 }
 0x216   :  { %v288_v43 = vmax.f32 %v282_v40, 0.0  ;;  %v285_v44 = vadd.f32 %v557_v38, %v284_v42  ;;  %v643_v45 = vpop.f32.mrb[3].mxu1 }
 0x218   :  { %530 = vst [vmem:[#allocation11] sm:$0xff] %v288_v43  ;;  %v289_v46 = vmax.f32 %v285_v44, 0.0 }
 0x21a   :  { %v290_v47 = vpack.c.bf16 %v289_v46, %v288_v43  ;;  %532 = vst [vmem:[#allocation11 + $0x10] sm:$0xff] %v289_v46 }
 0x21c   :  { %661 = vmatmul.mubr.bf16.vlgmr.msra.gmra.mrb[4].mxu0 %v290_v47 }
 0x2ef   :  { %v396_v51 = vpop.f32.mrb[4].mxu0 }
 0x2f0   :  { %v397_v52 = vadd.f32 %v566_v50, %v396_v51  ;;  %v662_v53 = vpop.f32.mrb[5].mxu0 }
 0x2f1   :  { %v399_v54 = vpop.f32.mrb[6].mxu0 }
 0x2f2   :  { %v400_v55 = vadd.f32 %v566_v50, %v399_v54  ;;  %v663_v56 = vpop.f32.mrb[7].mxu0  ;;  %v403_v57 = vmax.f32 %v397_v52, 0.0 }
 0x2f4   :  { %v404_v58 = vmax.f32 %v400_v55, 0.0 }
 0x2f6   :  { %v405_v59 = vpack.c.bf16 %v404_v58, %v403_v57 }
 0x2f8   :  { %681 = vmatmul.mubr.bf16.vlgmr.msra.gmra.mrb[4].mxu1 %v405_v59 }
 0x3cb   :  { %v511_v61 = vpop.f32.mrb[4].mxu1 }
 0x3cc   :  { %v512_v62 = vadd.f32 %v575_v60, %v511_v61  ;;  %v682_v63 = vpop.f32.mrb[5].mxu1 }
 0x3cd   :  { %v514_v0 = vpop.f32.mrb[6].mxu1 }
 0x3ce   :  { %v584_v1 = vmul.f32 -1.442695, %v512_v62  ;;  %v515_v2 = vadd.f32 %v575_v60, %v514_v0  ;;  %v683_v3 = vpop.f32.mrb[7].mxu1 }
 0x3d0   :  { %724 = vpow2.f32 %v584_v1  ;;  %v585_v4 = vmul.f32 -1.442695, %v515_v2 }
 0x3d2   :  { %726 = vpow2.f32 %v585_v4 }
 0x3da   :  { %v725_v5 = vpop.eup %724 }
 0x3db   :  { %v524_v6 = vadd.f32 1.0, %v725_v5 }
 0x3dc   :  { %v727_v7 = vpop.eup %726 }
 0x3dd   :  { %728 = vrcp.f32 %v524_v6  ;;  %v525_v8 = vadd.f32 1.0, %v727_v7 }
 0x3df   :  { %730 = vrcp.f32 %v525_v8 }
 0x3e7   :  { %v729_v9 = vpop.eup %728 }
 0x3e8   :  { %531 = vst [vmem:[#allocation11 + $0x8] sm:$0xff] %v729_v9 }
 0x3e9   :  { %v731_v10 = vpop.eup %730 }
 0x3ea   :  { %533 = vst [vmem:[#allocation11 + $0x18] sm:$0xff] %v731_v10 }
 0x3eb   :  { %853 = shalt.err (!%p850_p2)
}
 0x3ec   :  { %s854_s14 = scalar_lea.hbm %s1075_s9, 512 }
 0x3ed   :  { %p855_p3 = scmp.ne.s32.totalorder %s1075_s9, %s854_s14  ;;  %p858_p4 = scmp.lt.u32.totalorder %s854_s14, %s1075_s9 }
 0x3ef   :  { %p860_p5 = pnand %p858_p4, %p855_p3 }
 0x3f1   :  { %863 = shalt.err (!%p860_p5)
}
 0x3f2   :  { %s884_s26 = smov 256   ;;  %s885_s18 = smov 16  }
 0x3f3   :  { %545 = dma.vmem_to_hbm [thread:$0]  %s540_s13, 512, %s1075_s9, [#allocation4], %s884_s26, %s884_s26, %s885_s18  }
 0x3f4   :  { %870 = dma.done.wait [#allocation4], 512  }
 0x3f5   :  { %871 = vsyncadd [#allocation4], 4294966784 }
 0x3f6   :  { %549 = vsyncpa [#allocation3], 1 }
 0x3f7   :  { %550 = vsyncpa [#allocation6], 1 }
 0x3f8   :  { %551 = vsyncpa [#allocation9], 1 }
 0x3f9   :  { %552 = vsyncpa [#allocation4], 1 }

</bundles_post_ra>
